<compile_context>
chip_gen: v6e
topology: v6e:2x2x1
jax: 0.10.0
libtpu: 0.0.40
codegen_flags: <defaults>
</compile_context>

<pallas_src>
import jax
import jax.numpy as jnp
import numpy as np
from jax.experimental import pallas as pl
from jax.experimental.pallas import tpu as pltpu

# Small, module-consistent hyperparameters.
NUM_CLASSES = 3
C_EEG = 4                       # input_size[0]  (conv "height" = EEG channels)
T_LEN = 32                      # input_size[1]  (conv "width"  = time samples)
NUM_S = 4
HIDDEN = 32
POOL = 16                       # AvgPool2d kernel/stride along time
C_HALF = C_EEG // 2
W_OUT = T_LEN // POOL           # pooled time length
N_ROWS = 1 + C_EEG // C_HALF    # 3 rows after cat (1 from Sception1, 2 from Sception2)
FEAT = NUM_S * N_ROWS * W_OUT   # flattened feature size fed to fc1
F_ALL = NUM_S * N_ROWS * T_LEN  # un-pooled feature width inside the kernel (S*3*T)
BN_EPS = 1e-5


def sception_kernel(x_ref, wbig_ref, bbig_ref, a_ref, fc1b_ref,
                    fc2w_ref, fc2b_ref, out_ref):
    x = x_ref[...]                                             # (TILE_B, C*T)
    # Both conv branches + bias + ReLU in a single matmul.
    y = jnp.dot(x, wbig_ref[...], preferred_element_type=jnp.float32) + bbig_ref[...]
    y = jnp.maximum(y, 0.0)                                    # (TILE_B, S*3*T)
    # AvgPool + BatchNorm + fc1 (folded on host) + ReLU in a single matmul.
    h = jnp.dot(y, a_ref[...], preferred_element_type=jnp.float32) + fc1b_ref[...]
    h = jnp.maximum(h, 0.0)                                    # (TILE_B, HIDDEN)
    # fc2, one batched matmul, single dense store.
    out_ref[...] = (jnp.dot(h, fc2w_ref[...], preferred_element_type=jnp.float32)
                    + fc2b_ref[...])                           # (TILE_B, K)


def _prepare_params(params):
    """Host-side folding of conv / pool / BN / fc weights into three matmul operands."""
    w1 = params["w1"].reshape(NUM_S, C_EEG).astype(jnp.float32)      # from (S,1,C,1)
    w2 = params["w2"].reshape(NUM_S, C_HALF).astype(jnp.float32)     # from (S,1,C/2,1)
    b1 = params["b1"].astype(jnp.float32)                            # (S,)
    b2 = params["b2"].astype(jnp.float32)                            # (S,)

    # Per-(s, h) conv coefficients over the full C_EEG channels.
    coef = jnp.zeros((NUM_S, N_ROWS, C_EEG), jnp.float32)
    coef = coef.at[:, 0, :].set(w1)                  # Sception1: all channels
    coef = coef.at[:, 1, :C_HALF].set(w2)            # Sception2: first half
    coef = coef.at[:, 2, C_HALF:].set(w2)            # Sception2: second half

    # W_big[(c, t'), (s, h, t)] = coef[s, h, c] * (t' == t)   -> (C*T, S*3*T)
    eye_t = jnp.eye(T_LEN, dtype=jnp.float32)
    w_big = jnp.einsum('shc,ut->cusht', coef, eye_t).reshape(C_EEG * T_LEN, F_ALL)

    b_coef = jnp.stack([b1, b2, b2], axis=1)                         # (S, 3)
    bias_big = jnp.broadcast_to(b_coef[:, :, None],
                                (NUM_S, N_ROWS, T_LEN)).reshape(1, F_ALL)

    # Eval-mode BatchNorm folded into fc1.
    scale = params["bn_gamma"] / jnp.sqrt(params["bn_var"] + BN_EPS)  # (S,)
    shift = params["bn_beta"] - params["bn_mean"] * scale             # (S,)

    # fc1 weight in PyTorch (out, in) layout; flatten order of feat is (s, h, w).
    fc1_wT = params["fc1_w"].T.reshape(NUM_S, N_ROWS, W_OUT, HIDDEN).astype(jnp.float32)

    # Pool selector (T, W): 1 where t // POOL == w; 1/POOL and BN scale absorbed below.
    pool_sel = (jnp.arange(T_LEN)[:, None] // POOL
                == jnp.arange(W_OUT)[None, :]).astype(jnp.float32)

    a_all = jnp.einsum('tw,shwn->shtn', pool_sel, fc1_wT)             # (S,3,T,H)
    a_all = a_all * (scale / POOL)[:, None, None, None]
    a_all = a_all.reshape(F_ALL, HIDDEN)

    fc1_b_eff = (params["fc1_b"].astype(jnp.float32)
                 + jnp.einsum('s,shwn->n', shift, fc1_wT)).reshape(1, HIDDEN)

    fc2_w = params["fc2_w"].T.astype(jnp.float32)                     # (H, K)
    fc2_b = params["fc2_b"].reshape(1, NUM_CLASSES).astype(jnp.float32)

    return w_big, bias_big, a_all, fc1_b_eff, fc2_w, fc2_b


def sception_forward(x, params, max_tile_b=512):
    """x: (B, 1, C_eeg, T) float32, PyTorch NCHW."""
    B = x.shape[0]
    x_flat = x[:, 0, :, :].reshape(B, C_EEG * T_LEN).astype(jnp.float32)   # (B, C*T)
    w_big, bias_big, a_all, fc1_b, fc2_w, fc2_b = _prepare_params(params)

    tile_b = B if B <= max_tile_b else max_tile_b      # >8-aligned when tiling kicks in
    grid = (pl.cdiv(B, tile_b),)

    def full(arr):
        return pl.BlockSpec(arr.shape, lambda i: (0, 0))

    return pl.pallas_call(
        sception_kernel,
        out_shape=jax.ShapeDtypeStruct((B, NUM_CLASSES), jnp.float32),
        grid=grid,
        in_specs=[
            pl.BlockSpec((tile_b, C_EEG * T_LEN), lambda i: (i, 0)),   # x tile
            full(w_big), full(bias_big), full(a_all),
            full(fc1_b), full(fc2_w), full(fc2_b),
        ],
        out_specs=pl.BlockSpec((tile_b, NUM_CLASSES), lambda i: (i, 0)),
        compiler_params=pltpu.CompilerParams(dimension_semantics=("parallel",)),
    )(x_flat, w_big, bias_big, a_all, fc1_b, fc2_w, fc2_b)


def sception_reference(x, params):
    """Plain-JAX replica of the PyTorch forward (eval-mode BN/dropout)."""
    B = x.shape[0]
    xb = x[:, 0].astype(jnp.float32)                            # (B, C, T)
    w1 = params["w1"].reshape(NUM_S, C_EEG)
    w2 = params["w2"].reshape(NUM_S, C_HALF)
    y1 = jax.nn.relu(jnp.einsum('sc,bct->bst', w1, xb) + params["b1"][None, :, None])
    y1 = y1.reshape(B, NUM_S, 1, W_OUT, POOL).mean(-1)          # (B,S,1,W)
    xh = xb.reshape(B, C_EEG // C_HALF, C_HALF, T_LEN)          # (B,2,C/2,T)
    y2 = jax.nn.relu(jnp.einsum('sc,bhct->bsht', w2, xh)
                     + params["b2"][None, :, None, None])
    y2 = y2.reshape(B, NUM_S, C_EEG // C_HALF, W_OUT, POOL).mean(-1)  # (B,S,2,W)
    out = jnp.concatenate([y1, y2], axis=2)                     # (B,S,3,W)
    scale = params["bn_gamma"] / jnp.sqrt(params["bn_var"] + BN_EPS)
    shift = params["bn_beta"] - params["bn_mean"] * scale
    out = out * scale[None, :, None, None] + shift[None, :, None, None]
    flat = out.reshape(B, -1)
    h = jax.nn.relu(flat @ params["fc1_w"].T + params["fc1_b"])
    return h @ params["fc2_w"].T + params["fc2_b"]


if __name__ == "__main__":
    key = jax.random.PRNGKey(0)
    ks = jax.random.split(key, 12)
    params = {
        # Conv2d(1, num_S, (C,1)) weight shape (S,1,C,1); Conv2d(1,num_S,(C/2,1)) -> (S,1,C/2,1)
        "w1": 0.2 * jax.random.normal(ks[0], (NUM_S, 1, C_EEG, 1), jnp.float32),
        "b1": 0.1 * jax.random.normal(ks[1], (NUM_S,), jnp.float32),
        "w2": 0.2 * jax.random.normal(ks[2], (NUM_S, 1, C_HALF, 1), jnp.float32),
        "b2": 0.1 * jax.random.normal(ks[3], (NUM_S,), jnp.float32),
        # BatchNorm2d(num_S), eval mode: fresh running stats (mean=0, var=1).
        "bn_gamma": 1.0 + 0.1 * jax.random.normal(ks[4], (NUM_S,), jnp.float32),
        "bn_beta": 0.1 * jax.random.normal(ks[5], (NUM_S,), jnp.float32),
        "bn_mean": jnp.zeros((NUM_S,), jnp.float32),
        "bn_var": jnp.ones((NUM_S,), jnp.float32),
        # Linear(FEAT, HIDDEN) and Linear(HIDDEN, NUM_CLASSES), PyTorch (out,in) layout.
        "fc1_w": 0.2 * jax.random.normal(ks[6], (HIDDEN, FEAT), jnp.float32),
        "fc1_b": 0.1 * jax.random.normal(ks[7], (HIDDEN,), jnp.float32),
        "fc2_w": 0.2 * jax.random.normal(ks[8], (NUM_CLASSES, HIDDEN), jnp.float32),
        "fc2_b": 0.1 * jax.random.normal(ks[9], (NUM_CLASSES,), jnp.float32),
    }
    x = jax.random.normal(ks[10], (2, 1, C_EEG, T_LEN), jnp.float32)

    out = jax.block_until_ready(sception_forward(x, params))
    ref = jax.block_until_ready(sception_reference(x, params))
    np.testing.assert_allclose(np.asarray(out), np.asarray(ref), rtol=2e-3, atol=2e-3)
    print("KERNEL_OK")
</pallas_src>

<mosaic_0001>
module attributes {stable_mosaic.version = 11 : i64} {
  func.func @sception_kernel(%arg0: i32, %arg1: memref<2x128xf32, #tpu.memory_space<vmem>>, %arg2: memref<128x384xf32, #tpu.memory_space<vmem>>, %arg3: memref<1x384xf32, #tpu.memory_space<vmem>>, %arg4: memref<384x32xf32, #tpu.memory_space<vmem>>, %arg5: memref<1x32xf32, #tpu.memory_space<vmem>>, %arg6: memref<32x3xf32, #tpu.memory_space<vmem>>, %arg7: memref<1x3xf32, #tpu.memory_space<vmem>>, %arg8: memref<2x3xf32, #tpu.memory_space<vmem>>) attributes {dimension_semantics = [#tpu.dimension_semantics<parallel>], iteration_bounds = array<i64: 1>, scalar_prefetch = 0 : i64, scratch_operands = 0 : i64, tpu.core_type = #tpu.core_type<tc>, window_params = [{transform_indices = @transform_0, window_bounds = array<i64: 2, 128>}, {pipeline_mode = #tpu.pipeline_mode<synchronous>, transform_indices = @transform_1, window_bounds = array<i64: 128, 384>}, {pipeline_mode = #tpu.pipeline_mode<synchronous>, transform_indices = @transform_2, window_bounds = array<i64: 1, 384>}, {pipeline_mode = #tpu.pipeline_mode<synchronous>, transform_indices = @transform_3, window_bounds = array<i64: 384, 32>}, {pipeline_mode = #tpu.pipeline_mode<synchronous>, transform_indices = @transform_4, window_bounds = array<i64: 1, 32>}, {pipeline_mode = #tpu.pipeline_mode<synchronous>, transform_indices = @transform_5, window_bounds = array<i64: 32, 3>}, {pipeline_mode = #tpu.pipeline_mode<synchronous>, transform_indices = @transform_6, window_bounds = array<i64: 1, 3>}, {transform_indices = @transform_7, window_bounds = array<i64: 2, 3>}]} {
    %c0 = arith.constant 0 : index
    %c0_0 = arith.constant 0 : index
    %0 = vector.load %arg1[%c0, %c0_0] : memref<2x128xf32, #tpu.memory_space<vmem>>, vector<2x128xf32>
    %c0_1 = arith.constant 0 : index
    %c0_2 = arith.constant 0 : index
    %1 = vector.load %arg2[%c0_1, %c0_2] : memref<128x384xf32, #tpu.memory_space<vmem>>, vector<128x384xf32>
    %cst = arith.constant dense<0.000000e+00> : vector<2x384xf32>
    %2 = tpu.matmul %0, %1, %cst {dimension_numbers = #tpu.dot_dimension_numbers<[1], [0], [0], [1], [0, 0, 1, 1], [], []>} : vector<2x128xf32>, vector<128x384xf32>, vector<2x384xf32> -> vector<2x384xf32>
    %c0_3 = arith.constant 0 : index
    %c0_4 = arith.constant 0 : index
    %3 = vector.load %arg3[%c0_3, %c0_4] : memref<1x384xf32, #tpu.memory_space<vmem>>, vector<1x384xf32>
    %4 = vector.broadcast %3 : vector<1x384xf32> to vector<2x384xf32>
    %5 = arith.addf %2, %4 : vector<2x384xf32>
    %cst_5 = arith.constant 0.000000e+00 : f32
    %6 = vector.broadcast %cst_5 : f32 to vector<2x384xf32>
    %7 = arith.maximumf %5, %6 : vector<2x384xf32>
    %c0_6 = arith.constant 0 : index
    %c0_7 = arith.constant 0 : index
    %8 = vector.load %arg4[%c0_6, %c0_7] : memref<384x32xf32, #tpu.memory_space<vmem>>, vector<384x32xf32>
    %cst_8 = arith.constant dense<0.000000e+00> : vector<2x32xf32>
    %9 = tpu.matmul %7, %8, %cst_8 {dimension_numbers = #tpu.dot_dimension_numbers<[1], [0], [0], [1], [0, 0, 1, 1], [], []>} : vector<2x384xf32>, vector<384x32xf32>, vector<2x32xf32> -> vector<2x32xf32>
    %c0_9 = arith.constant 0 : index
    %c0_10 = arith.constant 0 : index
    %10 = vector.load %arg5[%c0_9, %c0_10] : memref<1x32xf32, #tpu.memory_space<vmem>>, vector<1x32xf32>
    %11 = vector.broadcast %10 : vector<1x32xf32> to vector<2x32xf32>
    %12 = arith.addf %9, %11 : vector<2x32xf32>
    %cst_11 = arith.constant 0.000000e+00 : f32
    %13 = vector.broadcast %cst_11 : f32 to vector<2x32xf32>
    %14 = arith.maximumf %12, %13 : vector<2x32xf32>
    %c0_12 = arith.constant 0 : index
    %c0_13 = arith.constant 0 : index
    %15 = vector.load %arg6[%c0_12, %c0_13] : memref<32x3xf32, #tpu.memory_space<vmem>>, vector<32x3xf32>
    %cst_14 = arith.constant dense<0.000000e+00> : vector<2x3xf32>
    %16 = tpu.matmul %14, %15, %cst_14 {dimension_numbers = #tpu.dot_dimension_numbers<[1], [0], [0], [1], [0, 0, 1, 1], [], []>} : vector<2x32xf32>, vector<32x3xf32>, vector<2x3xf32> -> vector<2x3xf32>
    %c0_15 = arith.constant 0 : index
    %c0_16 = arith.constant 0 : index
    %17 = vector.load %arg7[%c0_15, %c0_16] : memref<1x3xf32, #tpu.memory_space<vmem>>, vector<1x3xf32>
    %18 = vector.broadcast %17 : vector<1x3xf32> to vector<2x3xf32>
    %19 = arith.addf %16, %18 : vector<2x3xf32>
    %c0_17 = arith.constant 0 : index
    %c0_18 = arith.constant 0 : index
    %20 = vector.load %arg8[%c0_17, %c0_18] : memref<2x3xf32, #tpu.memory_space<vmem>>, vector<2x3xf32>
    tpu.vector_store %arg8[%c0_17, %c0_18], %19 {strides = array<i32>} : memref<2x3xf32, #tpu.memory_space<vmem>>, vector<2x3xf32>,
    return
  }
  func.func @transform_0(%arg0: i32) -> (i32, i32) {
    %c0_i32 = arith.constant 0 : i32
    %c0_i32_0 = arith.constant 0 : i32
    return %arg0, %c0_i32 : i32, i32
  }
  func.func @transform_1(%arg0: i32) -> (i32, i32) {
    %c0_i32 = arith.constant 0 : i32
    %c0_i32_0 = arith.constant 0 : i32
    %c0_i32_1 = arith.constant 0 : i32
    return %c0_i32, %c0_i32_0 : i32, i32
  }
  func.func @transform_2(%arg0: i32) -> (i32, i32) {
    %c0_i32 = arith.constant 0 : i32
    %c0_i32_0 = arith.constant 0 : i32
    %c0_i32_1 = arith.constant 0 : i32
    return %c0_i32, %c0_i32_0 : i32, i32
  }
  func.func @transform_3(%arg0: i32) -> (i32, i32) {
    %c0_i32 = arith.constant 0 : i32
    %c0_i32_0 = arith.constant 0 : i32
    %c0_i32_1 = arith.constant 0 : i32
    return %c0_i32, %c0_i32_0 : i32, i32
  }
  func.func @transform_4(%arg0: i32) -> (i32, i32) {
    %c0_i32 = arith.constant 0 : i32
    %c0_i32_0 = arith.constant 0 : i32
    %c0_i32_1 = arith.constant 0 : i32
    return %c0_i32, %c0_i32_0 : i32, i32
  }
  func.func @transform_5(%arg0: i32) -> (i32, i32) {
    %c0_i32 = arith.constant 0 : i32
    %c0_i32_0 = arith.constant 0 : i32
    %c0_i32_1 = arith.constant 0 : i32
    return %c0_i32, %c0_i32_0 : i32, i32
  }
  func.func @transform_6(%arg0: i32) -> (i32, i32) {
    %c0_i32 = arith.constant 0 : i32
    %c0_i32_0 = arith.constant 0 : i32
    %c0_i32_1 = arith.constant 0 : i32
    return %c0_i32, %c0_i32_0 : i32, i32
  }
  func.func @transform_7(%arg0: i32) -> (i32, i32) {
    %c0_i32 = arith.constant 0 : i32
    %c0_i32_0 = arith.constant 0 : i32
    return %arg0, %c0_i32 : i32, i32
  }
}

</mosaic_0001>

<bundles_post_ra>
// kernel: tpu_custom_call.1
= control target key start
LH: loop header
LB: loop body
LE: loop exit
PB: predicated region body
PF: predicated region fallthrough
CT: control target
= control target key end

     0   :  { %v717_v4 = vmov 0.0   ;;  %vm718_vm0 = vmmov 0   ;;  %s1118_s0 = inlined_call_operand.vmem [shape: f32[2,128], index: 0, kind: input, shape index: {}]   ;;  %s1119_s1 = inlined_call_operand.vmem [shape: f32[128,384], index: 1, kind: input, shape index: {}]   ;;  %s1120_s2 = inlined_call_operand.vmem [shape: f32[1,384], index: 2, kind: input, shape index: {}]   ;;  %s1121_s3 = inlined_call_operand.vmem [shape: f32[384,32], index: 3, kind: input, shape index: {}]   ;;  %s1122_s4 = inlined_call_operand.vmem [shape: f32[1,32], index: 4, kind: input, shape index: {}]   ;;  %s1123_s5 = inlined_call_operand.vmem [shape: f32[32,3], index: 5, kind: input, shape index: {}]   ;;  %s1124_s6 = inlined_call_operand.vmem [shape: f32[1,3], index: 6, kind: input, shape index: {}]   ;;  %s1125_s7 = inlined_call_operand.hbm [shape: f32[2,3], index: 7, kind: output, shape index: {}]  }
   0x1   :  { %v74_v0 = vld [vmem:[%s1119_s1 + $0x170] sm:$0xff]  ;;  %v73_v1 = vld [vmem:[%s1119_s1 + $0x168] sm:$0xff]  ;;  %v71_v2 = vld [vmem:[%s1119_s1 + $0x158] sm:$0xff]  ;;  %611 = vmatprep.subr.mxu1 %v717_v4  ;;  %157 = vmatprep.mubr.f32.mxu0 %v717_v4 }
   0x2   :  { %93 = vmatprep.subr.mxu0 %v74_v0  ;;  %v70_v3 = vld [vmem:[%s1119_s1 + $0x150] sm:$0xff]  ;;  %v68_v5 = vld [vmem:[%s1119_s1 + $0x140] sm:$0xff]  ;;  %v67_v6 = vld [vmem:[%s1119_s1 + $0x138] sm:$0xff]  ;;  %643 = vmatprep.mubr.msk.f32.mxu1 %vm718_vm0, %v717_v4 }
   0x3   :  { %94 = vmatpush1.msra.mxu0 %v73_v1  ;;  %v75_v7 = vld [vmem:[%s1119_s1 + $0x178] sm:$0xff]  ;;  %v65_v8 = vld [vmem:[%s1119_s1 + $0x128] sm:$0xff]  ;;  %v72_v9 = vld [vmem:[%s1119_s1 + $0x160] sm:$0xff] }
   0x4   :  { %95 = vmatprep.subr.mxu0 %v71_v2  ;;  %612 = vmatpush3.msra.mxu1 %v75_v7  ;;  %v64_v10 = vld [vmem:[%s1119_s1 + $0x120] sm:$0xff]  ;;  %v69_v11 = vld [vmem:[%s1119_s1 + $0x148] sm:$0xff]  ;;  %v62_v12 = vld [vmem:[%s1119_s1 + $0x110] sm:$0xff] }
   0x5   :  { %96 = vmatpush1.msra.mxu0 %v70_v3  ;;  %613 = vmatprep.subr.mxu1 %v717_v4  ;;  %v61_v13 = vld [vmem:[%s1119_s1 + $0x108] sm:$0xff]  ;;  %v66_v14 = vld [vmem:[%s1119_s1 + $0x130] sm:$0xff]  ;;  %v59_v15 = vld [vmem:[%s1119_s1 + $0xf8] sm:$0xff] }
   0x6   :  { %97 = vmatprep.subr.mxu0 %v68_v5  ;;  %614 = vmatpush3.msra.mxu1 %v72_v9  ;;  %v58_v16 = vld [vmem:[%s1119_s1 + $0xf0] sm:$0xff]  ;;  %v63_v17 = vld [vmem:[%s1119_s1 + $0x118] sm:$0xff]  ;;  %v56_v18 = vld [vmem:[%s1119_s1 + $0xe0] sm:$0xff] }
   0x7   :  { %98 = vmatpush1.msra.mxu0 %v67_v6  ;;  %615 = vmatprep.subr.mxu1 %v717_v4  ;;  %v55_v19 = vld [vmem:[%s1119_s1 + $0xd8] sm:$0xff]  ;;  %v60_v20 = vld [vmem:[%s1119_s1 + $0x100] sm:$0xff]  ;;  %v53_v21 = vld [vmem:[%s1119_s1 + $0xc8] sm:$0xff] }
   0x8   :  { %99 = vmatprep.subr.mxu0 %v65_v8  ;;  %616 = vmatpush3.msra.mxu1 %v69_v11  ;;  %v52_v22 = vld [vmem:[%s1119_s1 + $0xc0] sm:$0xff]  ;;  %v57_v23 = vld [vmem:[%s1119_s1 + $0xe8] sm:$0xff]  ;;  %v50_v24 = vld [vmem:[%s1119_s1 + $0xb0] sm:$0xff] }
   0x9   :  { %100 = vmatpush1.msra.mxu0 %v64_v10  ;;  %617 = vmatprep.subr.mxu1 %v717_v4  ;;  %v49_v25 = vld [vmem:[%s1119_s1 + $0xa8] sm:$0xff]  ;;  %v54_v26 = vld [vmem:[%s1119_s1 + $0xd0] sm:$0xff]  ;;  %v47_v27 = vld [vmem:[%s1119_s1 + $0x98] sm:$0xff] }
   0xa   :  { %101 = vmatprep.subr.mxu0 %v62_v12  ;;  %618 = vmatpush3.msra.mxu1 %v66_v14  ;;  %v46_v28 = vld [vmem:[%s1119_s1 + $0x90] sm:$0xff]  ;;  %v51_v29 = vld [vmem:[%s1119_s1 + $0xb8] sm:$0xff]  ;;  %v44_v30 = vld [vmem:[%s1119_s1 + $0x80] sm:$0xff] }
   0xb   :  { %102 = vmatpush1.msra.mxu0 %v61_v13  ;;  %619 = vmatprep.subr.mxu1 %v717_v4  ;;  %v43_v31 = vld [vmem:[%s1119_s1 + $0x78] sm:$0xff]  ;;  %v48_v32 = vld [vmem:[%s1119_s1 + $0xa0] sm:$0xff]  ;;  %v41_v33 = vld [vmem:[%s1119_s1 + $0x68] sm:$0xff] }
   0xc   :  { %103 = vmatprep.subr.mxu0 %v59_v15  ;;  %620 = vmatpush3.msra.mxu1 %v63_v17  ;;  %v40_v34 = vld [vmem:[%s1119_s1 + $0x60] sm:$0xff]  ;;  %v45_v35 = vld [vmem:[%s1119_s1 + $0x88] sm:$0xff]  ;;  %v38_v36 = vld [vmem:[%s1119_s1 + $0x50] sm:$0xff] }
   0xd   :  { %104 = vmatpush1.msra.mxu0 %v58_v16  ;;  %621 = vmatprep.subr.mxu1 %v717_v4  ;;  %v37_v37 = vld [vmem:[%s1119_s1 + $0x48] sm:$0xff]  ;;  %v42_v38 = vld [vmem:[%s1119_s1 + $0x70] sm:$0xff]  ;;  %v35_v39 = vld [vmem:[%s1119_s1 + $0x38] sm:$0xff] }
   0xe   :  { %105 = vmatprep.subr.mxu0 %v56_v18  ;;  %622 = vmatpush3.msra.mxu1 %v60_v20  ;;  %v34_v40 = vld [vmem:[%s1119_s1 + $0x30] sm:$0xff]  ;;  %v39_v41 = vld [vmem:[%s1119_s1 + $0x58] sm:$0xff]  ;;  %v32_v42 = vld [vmem:[%s1119_s1 + $0x20] sm:$0xff] }
   0xf   :  { %106 = vmatpush1.msra.mxu0 %v55_v19  ;;  %623 = vmatprep.subr.mxu1 %v717_v4  ;;  %v31_v43 = vld [vmem:[%s1119_s1 + $0x18] sm:$0xff]  ;;  %v36_v44 = vld [vmem:[%s1119_s1 + $0x40] sm:$0xff]  ;;  %v29_v45 = vld [vmem:[%s1119_s1 + $0x8] sm:$0xff] }
  0x10   :  { %107 = vmatprep.subr.mxu0 %v53_v21  ;;  %624 = vmatpush3.msra.mxu1 %v57_v23 }
  0x11   :  { %108 = vmatpush1.msra.mxu0 %v52_v22  ;;  %625 = vmatprep.subr.mxu1 %v717_v4 }
  0x12   :  { %109 = vmatprep.subr.mxu0 %v50_v24  ;;  %626 = vmatpush3.msra.mxu1 %v54_v26 }
  0x13   :  { %110 = vmatpush1.msra.mxu0 %v49_v25  ;;  %627 = vmatprep.subr.mxu1 %v717_v4 }
  0x14   :  { %111 = vmatprep.subr.mxu0 %v47_v27  ;;  %628 = vmatpush3.msra.mxu1 %v51_v29 }
  0x15   :  { %112 = vmatpush1.msra.mxu0 %v46_v28  ;;  %629 = vmatprep.subr.mxu1 %v717_v4 }
  0x16   :  { %113 = vmatprep.subr.mxu0 %v44_v30  ;;  %630 = vmatpush3.msra.mxu1 %v48_v32 }
  0x17   :  { %114 = vmatpush1.msra.mxu0 %v43_v31  ;;  %631 = vmatprep.subr.mxu1 %v717_v4 }
  0x18   :  { %115 = vmatprep.subr.mxu0 %v41_v33  ;;  %632 = vmatpush3.msra.mxu1 %v45_v35 }
  0x19   :  { %116 = vmatpush1.msra.mxu0 %v40_v34  ;;  %633 = vmatprep.subr.mxu1 %v717_v4 }
  0x1a   :  { %117 = vmatprep.subr.mxu0 %v38_v36  ;;  %634 = vmatpush3.msra.mxu1 %v42_v38 }
  0x1b   :  { %118 = vmatpush1.msra.mxu0 %v37_v37  ;;  %635 = vmatprep.subr.mxu1 %v717_v4 }
  0x1c   :  { %119 = vmatprep.subr.mxu0 %v35_v39  ;;  %636 = vmatpush3.msra.mxu1 %v39_v41 }
  0x1d   :  { %120 = vmatpush1.msra.mxu0 %v34_v40 }
  0x1e   :  { %12 = vsyncpa [#allocation3], 0  ;;  %121 = vmatprep.subr.mxu0 %v32_v42  ;;  %v28_v46 = vld [vmem:[%s1119_s1] sm:$0xff]  ;;  %637 = vmatprep.subr.mxu1 %v717_v4  ;;  %v33_v47 = vld [vmem:[%s1119_s1 + $0x28] sm:$0xff]  ;;  %v78_v35 = vlaneseq  ;;  %vm444_vm1 = vcmask 261120   ;;  %vm518_vm2 = vcmask 17408  }
  0x1f   :  { %122 = vmatpush1.msra.mxu0 %v31_v43  ;;  %v27_v48 = vld [vmem:[%s1118_s0] sm:$0x3]  ;;  %638 = vmatpush3.msra.mxu1 %v36_v44  ;;  %v30_v49 = vld [vmem:[%s1119_s1 + $0x10] sm:$0xff]  ;;  %v268_v50 = vld [vmem:[%s1121_s3 + $0xf8] sm:$0xff] }
  0x20   :  { %123 = vmatprep.subr.mxu0 %v29_v45  ;;  %639 = vmatprep.subr.mxu1 %v717_v4  ;;  %v252_v51 = vld [vmem:[%s1121_s3 + $0x78] sm:$0xff]  ;;  %v267_v52 = vld [vmem:[%s1121_s3 + $0xf0] sm:$0xff]  ;;  %v266_v55 = vld [vmem:[%s1121_s3 + $0xe8] sm:$0xff]  ;;  %v79_v36 = vshrl.u32 %v78_v35, 7 }
  0x21   :  { %124 = vmatpush1.msra.mxu0 %v28_v46  ;;  %640 = vmatpush3.msra.mxu1 %v33_v47  ;;  %v251_v53 = vld [vmem:[%s1121_s3 + $0x70] sm:$0xff]  ;;  %v284_v54 = vld [vmem:[%s1121_s3 + $0x178] sm:$0xff]  ;;  %v250_v56 = vld [vmem:[%s1121_s3 + $0x68] sm:$0xff] }
  0x22   :  { %158 = vmatmul.mubr.f32.vlgmr.msra.gmra.mxu0 %v27_v48  ;;  %641 = vmatprep.subr.mxu1 %v717_v4  ;;  %v283_v57 = vld [vmem:[%s1121_s3 + $0x170] sm:$0xff]  ;;  %v265_v58 = vld [vmem:[%s1121_s3 + $0xe0] sm:$0xff]  ;;  %v282_v60 = vld [vmem:[%s1121_s3 + $0x168] sm:$0xff]  ;;  %v80_v37 = vsub.s32 0, %v79_v36  ;;  %v84_v39 = vsub.s32 1, %v79_v36  ;;  %v88_v40 = vsub.s32 2, %v79_v36 }
  0x23   :  { %642 = vmatpush3.msra.mxu1 %v30_v49  ;;  %554 = vmatprep.subr.mxu0 %v268_v50  ;;  %v249_v59 = vld [vmem:[%s1121_s3 + $0x60] sm:$0xff]  ;;  %v264_v61 = vld [vmem:[%s1121_s3 + $0xd8] sm:$0xff]  ;;  %v263_v0 = vld [vmem:[%s1121_s3 + $0xd0] sm:$0xff] }
  0x24   :  { %644 = vmatmul.mubr.f32.vlgmr.msra.gmra.mxu1 %v27_v48  ;;  %555 = vmatpush3.msra.mxu0 %v252_v51  ;;  %v248_v62 = vld [vmem:[%s1121_s3 + $0x58] sm:$0xff]  ;;  %v281_v63 = vld [vmem:[%s1121_s3 + $0x160] sm:$0xff]  ;;  %v247_v1 = vld [vmem:[%s1121_s3 + $0x50] sm:$0xff] }
  0x25   :  { %556 = vmatprep.subr.mxu0 %v267_v52  ;;  %646 = vmatprep.subr.mxu1 %v717_v4  ;;  %v280_v2 = vld [vmem:[%s1121_s3 + $0x158] sm:$0xff]  ;;  %v262_v3 = vld [vmem:[%s1121_s3 + $0xc8] sm:$0xff]  ;;  %v279_v6 = vld [vmem:[%s1121_s3 + $0x150] sm:$0xff] }
  0x26   :  { %557 = vmatpush3.msra.mxu0 %v251_v53  ;;  %647 = vmatpush3.msra.mxu1 %v284_v54  ;;  %v246_v5 = vld [vmem:[%s1121_s3 + $0x48] sm:$0xff]  ;;  %v261_v7 = vld [vmem:[%s1121_s3 + $0xc0] sm:$0xff]  ;;  %v260_v10 = vld [vmem:[%s1121_s3 + $0xb8] sm:$0xff] }
  0x27   :  { %558 = vmatprep.subr.mxu0 %v266_v55  ;;  %648 = vmatprep.subr.mxu1 %v717_v4  ;;  %v245_v8 = vld [vmem:[%s1121_s3 + $0x40] sm:$0xff]  ;;  %v278_v9 = vld [vmem:[%s1121_s3 + $0x148] sm:$0xff]  ;;  %v244_v11 = vld [vmem:[%s1121_s3 + $0x38] sm:$0xff] }
  0x28   :  { %559 = vmatpush3.msra.mxu0 %v250_v56  ;;  %649 = vmatpush3.msra.mxu1 %v283_v57  ;;  %v277_v12 = vld [vmem:[%s1121_s3 + $0x140] sm:$0xff]  ;;  %v259_v13 = vld [vmem:[%s1121_s3 + $0xb0] sm:$0xff]  ;;  %v276_v15 = vld [vmem:[%s1121_s3 + $0x138] sm:$0xff] }
  0x29   :  { %560 = vmatprep.subr.mxu0 %v265_v58  ;;  %650 = vmatprep.subr.mxu1 %v717_v4  ;;  %v243_v14 = vld [vmem:[%s1121_s3 + $0x30] sm:$0xff]  ;;  %v258_v16 = vld [vmem:[%s1121_s3 + $0xa8] sm:$0xff]  ;;  %v257_v19 = vld [vmem:[%s1121_s3 + $0xa0] sm:$0xff] }
  0x2a   :  { %561 = vmatpush3.msra.mxu0 %v249_v59  ;;  %651 = vmatpush3.msra.mxu1 %v282_v60  ;;  %v242_v17 = vld [vmem:[%s1121_s3 + $0x28] sm:$0xff]  ;;  %v275_v18 = vld [vmem:[%s1121_s3 + $0x130] sm:$0xff]  ;;  %v241_v20 = vld [vmem:[%s1121_s3 + $0x20] sm:$0xff] }
  0x2b   :  { %562 = vmatprep.subr.mxu0 %v264_v61  ;;  %652 = vmatprep.subr.mxu1 %v717_v4  ;;  %v256_v21 = vld [vmem:[%s1121_s3 + $0x98] sm:$0xff]  ;;  %v274_v23 = vld [vmem:[%s1121_s3 + $0x128] sm:$0xff]  ;;  %v255_v24 = vld [vmem:[%s1121_s3 + $0x90] sm:$0xff] }
  0x2c   :  { %563 = vmatpush3.msra.mxu0 %v248_v62  ;;  %653 = vmatpush3.msra.mxu1 %v281_v63  ;;  %v240_v22 = vld [vmem:[%s1121_s3 + $0x18] sm:$0xff]  ;;  %v239_v25 = vld [vmem:[%s1121_s3 + $0x10] sm:$0xff]  ;;  %v273_v26 = vld [vmem:[%s1121_s3 + $0x120] sm:$0xff] }
  0x2d   :  { %564 = vmatprep.subr.mxu0 %v263_v0  ;;  %654 = vmatprep.subr.mxu1 %v717_v4  ;;  %v254_v27 = vld [vmem:[%s1121_s3 + $0x88] sm:$0xff]  ;;  %v272_v29 = vld [vmem:[%s1121_s3 + $0x118] sm:$0xff]  ;;  %v253_v30 = vld [vmem:[%s1121_s3 + $0x80] sm:$0xff] }
  0x2e   :  { %565 = vmatpush3.msra.mxu0 %v247_v1  ;;  %655 = vmatpush3.msra.mxu1 %v280_v2  ;;  %v238_v28 = vld [vmem:[%s1121_s3 + $0x8] sm:$0xff]  ;;  %v237_v31 = vld [vmem:[%s1121_s3] sm:$0xff]  ;;  %v271_v32 = vld [vmem:[%s1121_s3 + $0x110] sm:$0xff] }
  0x2f   :  { %566 = vmatprep.subr.mxu0 %v262_v3  ;;  %656 = vmatprep.subr.mxu1 %v717_v4  ;;  %v270_v33 = vld [vmem:[%s1121_s3 + $0x108] sm:$0xff]  ;;  %v269_v34 = vld [vmem:[%s1121_s3 + $0x100] sm:$0xff]  ;;  %v436_v54 = vld [vmem:[%s1123_s5 + $0x18] sm:$0xff] }
  0x30   :  { %567 = vmatpush3.msra.mxu0 %v246_v5  ;;  %657 = vmatpush3.msra.mxu1 %v279_v6  ;;  %v76_v38 = vld [vmem:[%s1120_s2] sm:$0x7]  ;;  %v435_v55 = vld [vmem:[%s1123_s5 + $0x10] sm:$0xff]  ;;  %v434_v56 = vld [vmem:[%s1123_s5 + $0x8] sm:$0xff] }
  0x31   :  { %568 = vmatprep.subr.mxu0 %v261_v7  ;;  %658 = vmatprep.subr.mxu1 %v717_v4  ;;  %v81_v41 = vrot.slane %v76_v38, %v80_v37  ;;  %v85_v42 = vrot.slane %v76_v38, %v84_v39  ;;  %v89_v43 = vrot.slane %v76_v38, %v88_v40  ;;  %v433_v57 = vld [vmem:[%s1123_s5] sm:$0xff]  ;;  %s719_s5 = smov [#allocation2]  }
  0x32   :  { %569 = vmatpush3.msra.mxu0 %v245_v8  ;;  %659 = vmatpush3.msra.mxu1 %v278_v9  ;;  %v534_v62 = vld [vmem:[%s1122_s4] ss:$0 sm:$0xff]  ;;  %s526_s13 = sshll.u32 %s719_s5, 4  ;;  %s527_s13 = int_to_ptr.vmem [resolvable:$true] %s526_s13 }
  0x33   :  { %570 = vmatprep.subr.mxu0 %v260_v10  ;;  %660 = vmatprep.subr.mxu1 %v717_v4  ;;  %s695_s14 = scalar_lea.vmem %s527_s13, 32  ;;  %p700_p1 = scmp.lt.s32.totalorder %s527_s13, %s527_s13 }
  0x34   :  { %571 = vmatpush3.msra.mxu0 %v244_v11  ;;  %661 = vmatpush3.msra.mxu1 %v277_v12  ;;  %p696_p0 = scmp.ne.s32.totalorder %s527_s13, %s695_s14  ;;  %p701_p2 = scmp.lt.s32.totalorder %s695_s14, %s695_s14 }
  0x35   :  { %572 = vmatprep.subr.mxu0 %v259_v13  ;;  %662 = vmatprep.subr.mxu1 %v717_v4 }
  0x36   :  { %573 = vmatpush3.msra.mxu0 %v243_v14  ;;  %663 = vmatpush3.msra.mxu1 %v276_v15  ;;  %p702_p3 = por %p701_p2, %p700_p1 }
  0x37   :  { %574 = vmatprep.subr.mxu0 %v258_v16  ;;  %664 = vmatprep.subr.mxu1 %v717_v4 }
  0x38   :  { %575 = vmatpush3.msra.mxu0 %v242_v17  ;;  %665 = vmatpush3.msra.mxu1 %v275_v18  ;;  %p703_p4 = pnand %p702_p3, %p696_p0 }
  0x39   :  { %576 = vmatprep.subr.mxu0 %v257_v19  ;;  %666 = vmatprep.subr.mxu1 %v717_v4 }
  0x3a   :  { %577 = vmatpush3.msra.mxu0 %v241_v20  ;;  %678 = vmatprep.mubr.msk.f32.mxu1 %vm718_vm0, %v717_v4 }
  0x3b   :  { %578 = vmatprep.subr.mxu0 %v256_v21  ;;  %667 = vmatpush3.msra.mxu1 %v274_v23 }
  0x3c   :  { %579 = vmatpush3.msra.mxu0 %v240_v22  ;;  %668 = vmatprep.subr.mxu1 %v717_v4 }
  0x3d   :  { %580 = vmatprep.subr.mxu0 %v255_v24  ;;  %669 = vmatpush3.msra.mxu1 %v273_v26 }
  0x3e   :  { %581 = vmatpush3.msra.mxu0 %v239_v25  ;;  %670 = vmatprep.subr.mxu1 %v717_v4 }
  0x3f   :  { %582 = vmatprep.subr.mxu0 %v254_v27  ;;  %671 = vmatpush3.msra.mxu1 %v272_v29 }
  0x40   :  { %583 = vmatpush3.msra.mxu0 %v238_v28  ;;  %672 = vmatprep.subr.mxu1 %v717_v4 }
  0x41   :  { %584 = vmatprep.subr.mxu0 %v253_v30  ;;  %673 = vmatpush3.msra.mxu1 %v271_v32 }
  0x42   :  { %585 = vmatpush3.msra.mxu0 %v237_v31  ;;  %674 = vmatprep.subr.mxu1 %v717_v4 }
  0x43   :  { %681 = vmatprep.subr.mxu0 %v717_v4  ;;  %675 = vmatpush3.msra.mxu1 %v270_v33 }
  0x44   :  { %676 = vmatprep.subr.mxu1 %v717_v4 }
  0x45   :  { %677 = vmatpush3.msra.mxu1 %v269_v34 }
  0xe2   :  { %v159_v44 = vpop.f32.mrf.mxu0 }
  0xe3   :  { %v160_v45 = vadd.f32 %v159_v44, %v81_v41 }
  0xe4   :  { %v161_v46 = vpop.f32.mrf.mxu0  ;;  %v230_v47 = vpop.f32.mrf.mxu1 }
  0xe5   :  { %v162_v48 = vadd.f32 %v161_v46, %v85_v42  ;;  %v231_v49 = vadd.f32 %v230_v47, %v89_v43  ;;  %v234_v53 = vmax.f32 %v160_v45, 0.0 }
  0xe6   :  { %v645_v50 = vpop.f32.mrf.mxu1 }
  0xe7   :  { %v235_v51 = vmax.f32 %v162_v48, 0.0  ;;  %v236_v52 = vmax.f32 %v231_v49, 0.0 }
  0xe9   :  { %356 = vmatprep.mubr.f32.mxu0 %v235_v51  ;;  %679 = vmatmul.mubr.f32.vlgmr.msra.gmra.mxu1 %v236_v52 }
  0xea   :  { %357 = vmatmul.mubr.f32.vlgmr.msra.gmra.mxu0 %v234_v53 }
  0xeb   :  { %689 = vmatprep.mubr.msk.f32.mxu0 %vm718_vm0, %v717_v4  ;;  %682 = vmatpush3.msra.mxu0 %v436_v54 }
  0xec   :  { %683 = vmatprep.subr.mxu0 %v717_v4 }
  0xed   :  { %684 = vmatpush3.msra.mxu0 %v435_v55 }
  0xee   :  { %685 = vmatprep.subr.mxu0 %v717_v4 }
  0xef   :  { %686 = vmatpush3.msra.mxu0 %v434_v56 }
  0xf0   :  { %687 = vmatprep.subr.mxu0 %v717_v4  ;;  %v535_v4 = vld [vmem:[%s1124_s6] ss:$0 sm:$0xff] }
  0xf1   :  { %688 = vmatpush3.msra.mxu0 %v433_v57 }
 0x1a9   :  { %v428_v58 = vpop.f32.mrf.mxu1 }
 0x1aa   :  { %v586_v59 = vpop.f32.mrf.mxu0 }
 0x1ab   :  { %v680_v60 = vpop.f32.mrf.mxu1 }
 0x1ac   :  { %v587_v61 = vpop.f32.mrf.mxu0 }
 0x1ad   :  { %v588_v63 = vadd.f32 %v587_v61, %v586_v59 }
 0x1af   :  { %v359_v0 = vadd.f32 %v588_v63, %v534_v62 }
 0x1b1   :  { %v429_v1 = vadd.f32 %v428_v58, %v359_v0 }
 0x1b3   :  { %v432_v2 = vmax.f32 %v429_v1, 0.0 }
 0x1b5   :  { %690 = vmatmul.mubr.msk.f32.vlgmr.msra.gmra.mxu0 %vm444_vm1, %v432_v2 }
 0x275   :  { %v514_v3 = vpop.f32.mrf.mxu0 }
 0x276   :  { %v515_v5 = vadd.f32 %v535_v4, %v514_v3 }
 0x277   :  { %v691_v6 = vpop.f32.mrf.mxu0 }
 0x278   :  { %519 = vst.msk [vmem:[#allocation2] sm:$0x3] %vm518_vm2, %v515_v5 }
 0x279   :  { %706 = shalt.err (!%p703_p4)
}
 0x27a   :  { %529 = dma.vmem_to_hbm [thread:$0]  %s527_s13, 32, %s1125_s7, [#allocation3]  }
 0x27b   :  { %715 = dma.done.wait [#allocation3], 32  }
 0x27c   :  { %716 = vsyncadd [#allocation3], 4294967264 }
 0x27d   :  { %533 = vsyncpa [#allocation3], 1 }

</bundles_post_ra>
